<compile_context>
chip_gen: v6e
topology: v6e:2x2x1
jax: 0.10.0
libtpu: 0.0.40
codegen_flags: <defaults>
</compile_context>

<pallas_src>
import functools
import math

import jax
import jax.numpy as jnp
from jax.experimental import pallas as pl
from jax.experimental.pallas import tpu as pltpu

_EPS = 1e-5
_LANES = 128

_TARGET_BLOCK_BYTES = 4 * 1024 * 1024    # HBM-side block target (input dtype bytes)
_F32_BLOCK_CAP_BYTES = 4 * 1024 * 1024   # cap on per-block f32 footprint (lane-padded)
_MIN_GRID_STEPS = 8                      # keep >= ~8 steps on big inputs (v7x dual-TC)
_MIN_TILE_ROWS = 1024                    # ...but never shrink tiles below this many rows

_COMPILER_PARAMS = pltpu.CompilerParams(
    dimension_semantics=("parallel",),       # rows are independent -> dual-TC on v7x
    vmem_limit_bytes=48 * 1024 * 1024,       # < 64 MiB (v7x physical); plenty on v5e/v6e
)


# ----------------------------------------------------------------------------
# In-register segmented all-reduce (lanes packed as G = 128//C segments of C)
# ----------------------------------------------------------------------------
def _seg_sum(v, seg_end_mask, C):
    """Per-segment sum, broadcast back to every lane of its segment.

    Segments of length C (a power of two dividing 128) are lane-aligned.
    Phase 1: log2(C) roll+add steps -> each lane holds the sum of the C lanes
             ending at it; the segment-end lane holds exactly its segment sum.
    Phase 2: mask to segment-end lanes, then log2(C) reverse roll+add steps to
             spread each segment sum over its C lanes.
    All work is XLU (roll) + VPU (add / one mul) -- the MXU stays idle and no
    select / bool broadcast is needed.
    """
    s = 1
    while s < C:
        v = v + pltpu.roll(v, shift=s, axis=1)
        s *= 2
    v = v * seg_end_mask                      # (1, 128) f32 constant, hoisted in wrapper
    s = 1
    while s < C:
        v = v + pltpu.roll(v, shift=_LANES - s, axis=1)
        s *= 2
    return v


# ----------------------------------------------------------------------------
# Kernels
# ----------------------------------------------------------------------------
def _layernorm_rows_kernel(x_ref, w_ref, b_ref, o_ref):
    """Direct path: block (TILE_R, C); normalize each row over the lane axis."""
    x = x_ref[...].astype(jnp.float32)
    mu = jnp.mean(x, axis=-1, keepdims=True)
    xc = x - mu
    var = jnp.mean(xc * xc, axis=-1, keepdims=True)      # centered, unbiased=False
    rstd = jax.lax.rsqrt(var + _EPS)                      # EUP, not VALU divide
    w = w_ref[...].astype(jnp.float32)
    b = b_ref[...].astype(jnp.float32)
    o_ref[...] = (xc * rstd * w + b).astype(o_ref.dtype)


def _layernorm_packed_kernel(x_ref, w_ref, b_ref, m_ref, o_ref, *, C):
    """Packed path (128 % C == 0): block (TILE_R, 128); each 128-lane row holds
    G = 128 // C consecutive logical rows. Segmented mean/var via roll reduce."""
    x = x_ref[...].astype(jnp.float32)                    # (R, 128)
    m = m_ref[...]                                        # (1, 128) f32 segment-end mask
    inv_c = jnp.float32(1.0 / C)
    mu = _seg_sum(x, m, C) * inv_c                        # per-segment mean on every lane
    xc = x - mu
    var = _seg_sum(xc * xc, m, C) * inv_c                 # centered, unbiased=False
    rstd = jax.lax.rsqrt(var + _EPS)
    o_ref[...] = (xc * rstd * w_ref[...] + b_ref[...]).astype(o_ref.dtype)


# ----------------------------------------------------------------------------
# Tile picker
# ----------------------------------------------------------------------------
def _pick_tile_rows(total_rows, lane_width, itemsize, sublane):
    """Largest sublane-multiple row tile with ~4 MiB HBM blocks, bounded f32 VMEM
    footprint, and enough grid steps on large inputs."""
    lane_pad = ((lane_width + _LANES - 1) // _LANES) * _LANES   # VMEM lane padding
    t_hbm = _TARGET_BLOCK_BYTES // max(lane_width * itemsize, 1)
    t_vmem = _F32_BLOCK_CAP_BYTES // max(lane_pad * 4, 1)
    t = max(sublane, min(t_hbm, t_vmem))
    # Keep >= ~_MIN_GRID_STEPS steps for dual-TC sharding / pipeline priming, but never
    # shrink a tile below _MIN_TILE_ROWS (and never above the VMEM cap, since t <= t_vmem).
    steps_cap = max(total_rows // _MIN_GRID_STEPS, _MIN_TILE_ROWS)
    t = min(t, steps_cap)
    t = max(sublane, (t // sublane) * sublane)
    if t >= total_rows:
        return total_rows            # full extent is always a legal block shape
    return t


# ----------------------------------------------------------------------------
# Wrapper
# ----------------------------------------------------------------------------
def withbias_layernorm(x, weight, bias):
    """Matches WithBias_LayerNorm.forward: mean/var (unbiased=False) over the last dim,
    (x - mu) / sqrt(var + 1e-5) * weight + bias."""
    orig_shape = x.shape
    C = orig_shape[-1]
    N = math.prod(orig_shape[:-1]) if len(orig_shape) > 1 else 1
    out_dtype = x.dtype
    itemsize = x.dtype.itemsize
    sublane = max(8, 32 // itemsize)          # 8 f32 / 16 bf16 / 32 int8
    x2 = x.reshape(N, C)

    pack = (C < _LANES) and (_LANES % C == 0)
    G = _LANES // C if pack else 1

    if pack and N % G == 0:
        # --- lane-packed path: G logical rows per 128-lane vector row (free reshape) ---
        rows = N // G
        xp = x2.reshape(rows, _LANES)
        tile = _pick_tile_rows(rows, _LANES, itemsize, sublane)
        w_t = jnp.tile(weight.reshape(1, C).astype(jnp.float32), (1, G))
        b_t = jnp.tile(bias.reshape(1, C).astype(jnp.float32), (1, G))
        seg_end = (jnp.arange(_LANES, dtype=jnp.int32) % C == C - 1)
        seg_end = seg_end.astype(jnp.float32).reshape(1, _LANES)
        out = pl.pallas_call(
            functools.partial(_layernorm_packed_kernel, C=C),
            out_shape=jax.ShapeDtypeStruct((rows, _LANES), out_dtype),
            grid=(pl.cdiv(rows, tile),),
            in_specs=[
                pl.BlockSpec((tile, _LANES), lambda i: (i, 0)),
                pl.BlockSpec((1, _LANES), lambda i: (0, 0)),
                pl.BlockSpec((1, _LANES), lambda i: (0, 0)),
                pl.BlockSpec((1, _LANES), lambda i: (0, 0)),
            ],
            out_specs=pl.BlockSpec((tile, _LANES), lambda i: (i, 0)),
            compiler_params=_COMPILER_PARAMS,
        )(xp, w_t, b_t, seg_end)
        return out.reshape(orig_shape)

    # --- direct path (C >= 128, C not a divisor of 128, or ragged row count) ---
    tile = _pick_tile_rows(N, C, itemsize, sublane)
    out = pl.pallas_call(
        _layernorm_rows_kernel,
        out_shape=jax.ShapeDtypeStruct((N, C), out_dtype),
        grid=(pl.cdiv(N, tile),),
        in_specs=[
            pl.BlockSpec((tile, C), lambda i: (i, 0)),
            pl.BlockSpec((1, C), lambda i: (0, 0)),
            pl.BlockSpec((1, C), lambda i: (0, 0)),
        ],
        out_specs=pl.BlockSpec((tile, C), lambda i: (i, 0)),
        compiler_params=_COMPILER_PARAMS,
    )(x2, weight.reshape(1, C), bias.reshape(1, C))
    return out.reshape(orig_shape)


# ----------------------------------------------------------------------------
# Pure-JAX reference (matches the PyTorch forward exactly)
# ----------------------------------------------------------------------------
def layernorm_ref(x, w, b):
    xf = x.astype(jnp.float32)
    mu = xf.mean(-1, keepdims=True)
    var = ((xf - mu) ** 2).mean(-1, keepdims=True)
    y = (xf - mu) / jnp.sqrt(var + _EPS) * w.astype(jnp.float32) + b.astype(jnp.float32)
    return y.astype(x.dtype)


if __name__ == "__main__":
    key = jax.random.PRNGKey(0)
    k1, k2, k3, k4, k5 = jax.random.split(key, 5)
    fwd = jax.jit(withbias_layernorm)

    # 1) Small-C case (Restormer-style tokens x channels, dim=8) -> lane-packed path.
    #    Non-zero mean stresses the centered-variance path.
    B, L, C = 2, 16 * 16, 8
    x = jax.random.normal(k1, (B, L, C), jnp.float32) * 2.0 + 3.0
    w = 1.0 + 0.1 * jax.random.normal(k2, (C,), jnp.float32)
    b = 0.1 * jax.random.normal(k3, (C,), jnp.float32)
    out = jax.block_until_ready(fwd(x, w, b))
    assert out.shape == x.shape and out.dtype == x.dtype
    err = float(jnp.max(jnp.abs(out - layernorm_ref(x, w, b))))
    assert err < 2e-4, f"packed-path mismatch: {err}"

    # 2) Lane-dense C (multiple of 128) -> direct row-tiled path.
    C2 = 256
    x2 = jax.random.normal(k4, (2, 64, C2), jnp.float32)
    w2 = jnp.ones((C2,), jnp.float32)
    b2 = jnp.zeros((C2,), jnp.float32)
    out2 = jax.block_until_ready(fwd(x2, w2, b2))
    err2 = float(jnp.max(jnp.abs(out2 - layernorm_ref(x2, w2, b2))))
    assert err2 < 2e-4, f"direct-path mismatch: {err2}"

    # 3) Small C with row count not a multiple of the pack factor -> direct fallback
    #    (no full-tensor pad/slice copies).
    x3 = jax.random.normal(k5, (2, 7, 8), jnp.float32)
    out3 = jax.block_until_ready(fwd(x3, w, b))
    err3 = float(jnp.max(jnp.abs(out3 - layernorm_ref(x3, w, b))))
    assert err3 < 2e-4, f"fallback-path mismatch: {err3}"

    print("KERNEL_OK")
</pallas_src>

<mosaic_0001>
module attributes {stable_mosaic.version = 11 : i64} {
  func.func @_layernorm_packed_kernel(%arg0: i32, %arg1: memref<32x128xf32, #tpu.memory_space<vmem>>, %arg2: memref<1x128xf32, #tpu.memory_space<vmem>>, %arg3: memref<1x128xf32, #tpu.memory_space<vmem>>, %arg4: memref<1x128xf32, #tpu.memory_space<vmem>>, %arg5: memref<32x128xf32, #tpu.memory_space<vmem>>) attributes {dimension_semantics = [#tpu.dimension_semantics<parallel>], iteration_bounds = array<i64: 1>, scalar_prefetch = 0 : i64, scratch_operands = 0 : i64, tpu.core_type = #tpu.core_type<tc>, window_params = [{transform_indices = @transform_0, window_bounds = array<i64: 32, 128>}, {pipeline_mode = #tpu.pipeline_mode<synchronous>, transform_indices = @transform_1, window_bounds = array<i64: 1, 128>}, {pipeline_mode = #tpu.pipeline_mode<synchronous>, transform_indices = @transform_2, window_bounds = array<i64: 1, 128>}, {pipeline_mode = #tpu.pipeline_mode<synchronous>, transform_indices = @transform_3, window_bounds = array<i64: 1, 128>}, {transform_indices = @transform_4, window_bounds = array<i64: 32, 128>}]} {
    %c0 = arith.constant 0 : index
    %c0_0 = arith.constant 0 : index
    %0 = vector.load %arg1[%c0, %c0_0] : memref<32x128xf32, #tpu.memory_space<vmem>>, vector<32x128xf32>
    %c0_1 = arith.constant 0 : index
    %c0_2 = arith.constant 0 : index
    %1 = vector.load %arg4[%c0_1, %c0_2] : memref<1x128xf32, #tpu.memory_space<vmem>>, vector<1x128xf32>
    %c1_i32 = arith.constant 1 : i32
    %2 = tpu.dynamic_rotate %0 by %c1_i32 dim 1 : vector<32x128xf32>, i32 -> vector<32x128xf32>
    %3 = arith.addf %0, %2 : vector<32x128xf32>
    %c2_i32 = arith.constant 2 : i32
    %4 = tpu.dynamic_rotate %3 by %c2_i32 dim 1 : vector<32x128xf32>, i32 -> vector<32x128xf32>
    %5 = arith.addf %3, %4 : vector<32x128xf32>
    %c4_i32 = arith.constant 4 : i32
    %6 = tpu.dynamic_rotate %5 by %c4_i32 dim 1 : vector<32x128xf32>, i32 -> vector<32x128xf32>
    %7 = arith.addf %5, %6 : vector<32x128xf32>
    %8 = vector.broadcast %1 : vector<1x128xf32> to vector<32x128xf32>
    %9 = arith.mulf %7, %8 : vector<32x128xf32>
    %c127_i32 = arith.constant 127 : i32
    %10 = tpu.dynamic_rotate %9 by %c127_i32 dim 1 : vector<32x128xf32>, i32 -> vector<32x128xf32>
    %11 = arith.addf %9, %10 : vector<32x128xf32>
    %c126_i32 = arith.constant 126 : i32
    %12 = tpu.dynamic_rotate %11 by %c126_i32 dim 1 : vector<32x128xf32>, i32 -> vector<32x128xf32>
    %13 = arith.addf %11, %12 : vector<32x128xf32>
    %c124_i32 = arith.constant 124 : i32
    %14 = tpu.dynamic_rotate %13 by %c124_i32 dim 1 : vector<32x128xf32>, i32 -> vector<32x128xf32>
    %15 = arith.addf %13, %14 : vector<32x128xf32>
    %cst = arith.constant 1.250000e-01 : f32
    %16 = vector.broadcast %cst : f32 to vector<32x128xf32>
    %17 = arith.mulf %15, %16 : vector<32x128xf32>
    %18 = arith.subf %0, %17 : vector<32x128xf32>
    %19 = arith.mulf %18, %18 : vector<32x128xf32>
    %c1_i32_3 = arith.constant 1 : i32
    %20 = tpu.dynamic_rotate %19 by %c1_i32_3 dim 1 : vector<32x128xf32>, i32 -> vector<32x128xf32>
    %21 = arith.addf %19, %20 : vector<32x128xf32>
    %c2_i32_4 = arith.constant 2 : i32
    %22 = tpu.dynamic_rotate %21 by %c2_i32_4 dim 1 : vector<32x128xf32>, i32 -> vector<32x128xf32>
    %23 = arith.addf %21, %22 : vector<32x128xf32>
    %c4_i32_5 = arith.constant 4 : i32
    %24 = tpu.dynamic_rotate %23 by %c4_i32_5 dim 1 : vector<32x128xf32>, i32 -> vector<32x128xf32>
    %25 = arith.addf %23, %24 : vector<32x128xf32>
    %26 = vector.broadcast %1 : vector<1x128xf32> to vector<32x128xf32>
    %27 = arith.mulf %25, %26 : vector<32x128xf32>
    %c127_i32_6 = arith.constant 127 : i32
    %28 = tpu.dynamic_rotate %27 by %c127_i32_6 dim 1 : vector<32x128xf32>, i32 -> vector<32x128xf32>
    %29 = arith.addf %27, %28 : vector<32x128xf32>
    %c126_i32_7 = arith.constant 126 : i32
    %30 = tpu.dynamic_rotate %29 by %c126_i32_7 dim 1 : vector<32x128xf32>, i32 -> vector<32x128xf32>
    %31 = arith.addf %29, %30 : vector<32x128xf32>
    %c124_i32_8 = arith.constant 124 : i32
    %32 = tpu.dynamic_rotate %31 by %c124_i32_8 dim 1 : vector<32x128xf32>, i32 -> vector<32x128xf32>
    %33 = arith.addf %31, %32 : vector<32x128xf32>
    %cst_9 = arith.constant 1.250000e-01 : f32
    %34 = vector.broadcast %cst_9 : f32 to vector<32x128xf32>
    %35 = arith.mulf %33, %34 : vector<32x128xf32>
    %cst_10 = arith.constant 9.99999974E-6 : f32
    %36 = vector.broadcast %cst_10 : f32 to vector<32x128xf32>
    %37 = arith.addf %35, %36 : vector<32x128xf32>
    %38 = math.rsqrt %37 : vector<32x128xf32>
    %39 = arith.mulf %18, %38 : vector<32x128xf32>
    %c0_11 = arith.constant 0 : index
    %c0_12 = arith.constant 0 : index
    %40 = vector.load %arg2[%c0_11, %c0_12] : memref<1x128xf32, #tpu.memory_space<vmem>>, vector<1x128xf32>
    %41 = vector.broadcast %40 : vector<1x128xf32> to vector<32x128xf32>
    %42 = arith.mulf %39, %41 : vector<32x128xf32>
    %c0_13 = arith.constant 0 : index
    %c0_14 = arith.constant 0 : index
    %43 = vector.load %arg3[%c0_13, %c0_14] : memref<1x128xf32, #tpu.memory_space<vmem>>, vector<1x128xf32>
    %44 = vector.broadcast %43 : vector<1x128xf32> to vector<32x128xf32>
    %45 = arith.addf %42, %44 : vector<32x128xf32>
    %c0_15 = arith.constant 0 : index
    %c0_16 = arith.constant 0 : index
    %46 = vector.load %arg5[%c0_15, %c0_16] : memref<32x128xf32, #tpu.memory_space<vmem>>, vector<32x128xf32>
    tpu.vector_store %arg5[%c0_15, %c0_16], %45 {strides = array<i32>} : memref<32x128xf32, #tpu.memory_space<vmem>>, vector<32x128xf32>,
    return
  }
  func.func @transform_0(%arg0: i32) -> (i32, i32) {
    %c0_i32 = arith.constant 0 : i32
    %c0_i32_0 = arith.constant 0 : i32
    return %arg0, %c0_i32 : i32, i32
  }
  func.func @transform_1(%arg0: i32) -> (i32, i32) {
    %c0_i32 = arith.constant 0 : i32
    %c0_i32_0 = arith.constant 0 : i32
    %c0_i32_1 = arith.constant 0 : i32
    return %c0_i32, %c0_i32_0 : i32, i32
  }
  func.func @transform_2(%arg0: i32) -> (i32, i32) {
    %c0_i32 = arith.constant 0 : i32
    %c0_i32_0 = arith.constant 0 : i32
    %c0_i32_1 = arith.constant 0 : i32
    return %c0_i32, %c0_i32_0 : i32, i32
  }
  func.func @transform_3(%arg0: i32) -> (i32, i32) {
    %c0_i32 = arith.constant 0 : i32
    %c0_i32_0 = arith.constant 0 : i32
    %c0_i32_1 = arith.constant 0 : i32
    return %c0_i32, %c0_i32_0 : i32, i32
  }
  func.func @transform_4(%arg0: i32) -> (i32, i32) {
    %c0_i32 = arith.constant 0 : i32
    %c0_i32_0 = arith.constant 0 : i32
    return %arg0, %c0_i32 : i32, i32
  }
}

</mosaic_0001>

<bundles_post_ra>
// kernel: withbias_layernorm.1
= control target key start
LH: loop header
LB: loop body
LE: loop exit
PB: predicated region body
PF: predicated region fallthrough
CT: control target
= control target key end

     0   :  { %s255_s19 = smov 1   ;;  %s256_s24 = smov 2   ;;  %s417_s0 = inlined_call_operand.vmem [shape: f32[32,128], index: 0, kind: input, shape index: {}]   ;;  %s418_s3 = inlined_call_operand.vmem [shape: f32[1,128], index: 3, kind: input, shape index: {}]   ;;  %s419_s1 = inlined_call_operand.vmem [shape: f32[1,128], index: 1, kind: input, shape index: {}]   ;;  %s420_s2 = inlined_call_operand.vmem [shape: f32[1,128], index: 2, kind: input, shape index: {}]   ;;  %s421_s4 = inlined_call_operand.vmem [shape: f32[32,128], index: 4, kind: output, shape index: {}]  }
   0x1   :  { %v289_v0 = vld [vmem:[%s417_s0] sm:$0xff]  ;;  %v294_v1 = vld [vmem:[%s417_s0 + $0x10] sm:$0xff]  ;;  %v303_v2 = vld [vmem:[%s417_s0 + $0x8] sm:$0xff]  ;;  %s258_s27 = smov 127   ;;  %s260_s28 = smov 124  }
   0x2   :  { %22 = vrot.lane.b32.xlu0 %v289_v0, %s255_s19  ;;  %26 = vrot.lane.b32.xlu1 %v294_v1, %s255_s19  ;;  %v308_v3 = vld [vmem:[%s417_s0 + $0x18] sm:$0xff]  ;;  %s257_s0 = smov 4   ;;  %v329_v20 = vld [vmem:[%s418_s3] ss:$0 sm:$0xff]  ;;  %s259_s3 = smov 126  }
   0x6   :  { %24 = vrot.lane.b32.xlu0 %v303_v2, %s255_s19  ;;  %28 = vrot.lane.b32.xlu1 %v308_v3, %s255_s19 }
  0x74   :  { %v23_v4 = vpop.permute.xlu0 %22  ;;  %v27_v5 = vpop.permute.xlu1 %26 }
  0x75   :  { %v30_v6 = vadd.f32 %v23_v4, %v289_v0  ;;  %v32_v7 = vadd.f32 %v27_v5, %v294_v1 }
  0x77   :  { %34 = vrot.lane.b32.xlu0 %v30_v6, %s256_s24 }
  0x78   :  { %v25_v8 = vpop.permute.xlu0 %24  ;;  %v29_v9 = vpop.permute.xlu1 %28 }
  0x79   :  { %v31_v10 = vadd.f32 %v25_v8, %v303_v2  ;;  %v33_v11 = vadd.f32 %v29_v9, %v308_v3 }
  0x7b   :  { %38 = vrot.lane.b32.xlu0 %v32_v7, %s256_s24  ;;  %36 = vrot.lane.b32.xlu1 %v31_v10, %s256_s24 }
  0x7f   :  { %40 = vrot.lane.b32.xlu1 %v33_v11, %s256_s24 }
  0xe9   :  { %v35_v12 = vpop.permute.xlu0 %34 }
  0xea   :  { %v42_v13 = vadd.f32 %v35_v12, %v30_v6 }
  0xec   :  { %46 = vrot.lane.b32.xlu0 %v42_v13, %s257_s0 }
  0xed   :  { %v37_v14 = vpop.permute.xlu1 %36  ;;  %v39_v15 = vpop.permute.xlu0 %38 }
  0xee   :  { %v43_v16 = vadd.f32 %v37_v14, %v31_v10  ;;  %v44_v17 = vadd.f32 %v39_v15, %v32_v7 }
  0xf0   :  { %48 = vrot.lane.b32.xlu1 %v43_v16, %s257_s0  ;;  %50 = vrot.lane.b32.xlu0 %v44_v17, %s257_s0 }
  0xf1   :  { %v41_v18 = vpop.permute.xlu1 %40 }
  0xf2   :  { %v45_v19 = vadd.f32 %v41_v18, %v33_v11 }
  0xf4   :  { %52 = vrot.lane.b32.xlu1 %v45_v19, %s257_s0 }
 0x15e   :  { %v47_v21 = vpop.permute.xlu0 %46 }
 0x15f   :  { %v54_v22 = vadd.f32 %v47_v21, %v42_v13 }
 0x161   :  { %v64_v23 = vmul.f32 %v329_v20, %v54_v22 }
 0x162   :  { %v49_v24 = vpop.permute.xlu1 %48  ;;  %v51_v25 = vpop.permute.xlu0 %50 }
 0x163   :  { %v55_v26 = vadd.f32 %v49_v24, %v43_v16  ;;  %v56_v27 = vadd.f32 %v51_v25, %v44_v17  ;;  %68 = vrot.lane.b32.xlu0 %v64_v23, %s258_s27 }
 0x165   :  { %v65_v28 = vmul.f32 %v329_v20, %v55_v26  ;;  %v66_v29 = vmul.f32 %v329_v20, %v56_v27 }
 0x166   :  { %v53_v30 = vpop.permute.xlu1 %52 }
 0x167   :  { %v57_v31 = vadd.f32 %v53_v30, %v45_v19  ;;  %70 = vrot.lane.b32.xlu1 %v65_v28, %s258_s27  ;;  %72 = vrot.lane.b32.xlu0 %v66_v29, %s258_s27 }
 0x169   :  { %v67_v32 = vmul.f32 %v329_v20, %v57_v31 }
 0x16b   :  { %74 = vrot.lane.b32.xlu1 %v67_v32, %s258_s27 }
 0x1d5   :  { %v69_v33 = vpop.permute.xlu0 %68 }
 0x1d6   :  { %v76_v34 = vadd.f32 %v69_v33, %v64_v23 }
 0x1d8   :  { %80 = vrot.lane.b32.xlu0 %v76_v34, %s259_s3 }
 0x1d9   :  { %v71_v35 = vpop.permute.xlu1 %70  ;;  %v73_v36 = vpop.permute.xlu0 %72 }
 0x1da   :  { %v77_v37 = vadd.f32 %v71_v35, %v65_v28  ;;  %v78_v38 = vadd.f32 %v73_v36, %v66_v29 }
 0x1dc   :  { %82 = vrot.lane.b32.xlu1 %v77_v37, %s259_s3  ;;  %84 = vrot.lane.b32.xlu0 %v78_v38, %s259_s3 }
 0x1dd   :  { %v75_v39 = vpop.permute.xlu1 %74 }
 0x1de   :  { %v79_v40 = vadd.f32 %v75_v39, %v67_v32 }
 0x1e0   :  { %86 = vrot.lane.b32.xlu1 %v79_v40, %s259_s3 }
 0x24a   :  { %v81_v41 = vpop.permute.xlu0 %80 }
 0x24b   :  { %v88_v42 = vadd.f32 %v81_v41, %v76_v34 }
 0x24d   :  { %92 = vrot.lane.b32.xlu0 %v88_v42, %s260_s28 }
 0x24e   :  { %v83_v43 = vpop.permute.xlu1 %82  ;;  %v85_v44 = vpop.permute.xlu0 %84 }
 0x24f   :  { %v89_v45 = vadd.f32 %v83_v43, %v77_v37  ;;  %v90_v46 = vadd.f32 %v85_v44, %v78_v38 }
 0x251   :  { %94 = vrot.lane.b32.xlu1 %v89_v45, %s260_s28  ;;  %96 = vrot.lane.b32.xlu0 %v90_v46, %s260_s28 }
 0x252   :  { %v87_v47 = vpop.permute.xlu1 %86 }
 0x253   :  { %v91_v48 = vadd.f32 %v87_v47, %v79_v40 }
 0x255   :  { %98 = vrot.lane.b32.xlu1 %v91_v48, %s260_s28 }
 0x2bf   :  { %v93_v49 = vpop.permute.xlu0 %92 }
 0x2c0   :  { %v100_v50 = vadd.f32 %v93_v49, %v88_v42 }
 0x2c2   :  { %v104_v51 = vmul.f32 0.125, %v100_v50 }
 0x2c3   :  { %v95_v52 = vpop.permute.xlu1 %94  ;;  %v97_v53 = vpop.permute.xlu0 %96 }
 0x2c4   :  { %v348_v54 = vsub.f32 %v289_v0, %v104_v51  ;;  %v101_v55 = vadd.f32 %v95_v52, %v89_v45  ;;  %v102_v56 = vadd.f32 %v97_v53, %v90_v46 }
 0x2c6   :  { %v105_v57 = vmul.f32 0.125, %v101_v55  ;;  %v106_v58 = vmul.f32 0.125, %v102_v56  ;;  %v112_v59 = vmul.f32 %v348_v54, %v348_v54 }
 0x2c7   :  { %v99_v60 = vpop.permute.xlu1 %98 }
 0x2c8   :  { %v353_v61 = vsub.f32 %v303_v2, %v105_v57  ;;  %v356_v62 = vsub.f32 %v294_v1, %v106_v58  ;;  %v103_v63 = vadd.f32 %v99_v60, %v91_v48  ;;  %116 = vrot.lane.b32.xlu0 %v112_v59, %s255_s19 }
 0x2ca   :  { %v107_v4 = vmul.f32 0.125, %v103_v63  ;;  %v113_v0 = vmul.f32 %v353_v61, %v353_v61  ;;  %v114_v5 = vmul.f32 %v356_v62, %v356_v62 }
 0x2cc   :  { %v364_v6 = vsub.f32 %v308_v3, %v107_v4  ;;  %118 = vrot.lane.b32.xlu1 %v113_v0, %s255_s19  ;;  %120 = vrot.lane.b32.xlu0 %v114_v5, %s255_s19 }
 0x2ce   :  { %v115_v1 = vmul.f32 %v364_v6, %v364_v6 }
 0x2d0   :  { %122 = vrot.lane.b32.xlu1 %v115_v1, %s255_s19 }
 0x33a   :  { %v117_v2 = vpop.permute.xlu0 %116 }
 0x33b   :  { %v124_v7 = vadd.f32 %v117_v2, %v112_v59 }
 0x33d   :  { %128 = vrot.lane.b32.xlu0 %v124_v7, %s256_s24 }
 0x33e   :  { %v119_v8 = vpop.permute.xlu1 %118  ;;  %v121_v9 = vpop.permute.xlu0 %120 }
 0x33f   :  { %v125_v10 = vadd.f32 %v119_v8, %v113_v0  ;;  %v126_v11 = vadd.f32 %v121_v9, %v114_v5  ;;  %v240_v9 = vld [vmem:[%s420_s2] ss:$0 sm:$0xff] }
 0x341   :  { %130 = vrot.lane.b32.xlu1 %v125_v10, %s256_s24  ;;  %132 = vrot.lane.b32.xlu0 %v126_v11, %s256_s24 }
 0x342   :  { %v123_v3 = vpop.permute.xlu1 %122 }
 0x343   :  { %v127_v12 = vadd.f32 %v123_v3, %v115_v1 }
 0x345   :  { %134 = vrot.lane.b32.xlu1 %v127_v12, %s256_s24 }
 0x3af   :  { %v129_v13 = vpop.permute.xlu0 %128 }
 0x3b0   :  { %v136_v14 = vadd.f32 %v129_v13, %v124_v7  ;;  %v239_v7 = vld [vmem:[%s419_s1] ss:$0 sm:$0xff] }
 0x3b2   :  { %140 = vrot.lane.b32.xlu0 %v136_v14, %s257_s0 }
 0x3b3   :  { %v131_v15 = vpop.permute.xlu1 %130  ;;  %v133_v16 = vpop.permute.xlu0 %132 }
 0x3b4   :  { %v137_v17 = vadd.f32 %v131_v15, %v125_v10  ;;  %v138_v18 = vadd.f32 %v133_v16, %v126_v11 }
 0x3b6   :  { %142 = vrot.lane.b32.xlu1 %v137_v17, %s257_s0  ;;  %144 = vrot.lane.b32.xlu0 %v138_v18, %s257_s0 }
 0x3b7   :  { %v135_v19 = vpop.permute.xlu1 %134 }
 0x3b8   :  { %v139_v21 = vadd.f32 %v135_v19, %v127_v12 }
 0x3ba   :  { %146 = vrot.lane.b32.xlu1 %v139_v21, %s257_s0 }
 0x424   :  { %v141_v22 = vpop.permute.xlu0 %140 }
 0x425   :  { %v148_v23 = vadd.f32 %v141_v22, %v136_v14 }
 0x427   :  { %v152_v24 = vmul.f32 %v329_v20, %v148_v23 }
 0x428   :  { %v143_v25 = vpop.permute.xlu1 %142  ;;  %v145_v26 = vpop.permute.xlu0 %144 }
 0x429   :  { %v149_v27 = vadd.f32 %v143_v25, %v137_v17  ;;  %v150_v28 = vadd.f32 %v145_v26, %v138_v18  ;;  %156 = vrot.lane.b32.xlu0 %v152_v24, %s258_s27 }
 0x42b   :  { %v153_v29 = vmul.f32 %v329_v20, %v149_v27  ;;  %v154_v30 = vmul.f32 %v329_v20, %v150_v28 }
 0x42c   :  { %v147_v31 = vpop.permute.xlu1 %146 }
 0x42d   :  { %v151_v32 = vadd.f32 %v147_v31, %v139_v21  ;;  %158 = vrot.lane.b32.xlu1 %v153_v29, %s258_s27  ;;  %160 = vrot.lane.b32.xlu0 %v154_v30, %s258_s27 }
 0x42f   :  { %v155_v33 = vmul.f32 %v329_v20, %v151_v32 }
 0x431   :  { %162 = vrot.lane.b32.xlu1 %v155_v33, %s258_s27 }
 0x49b   :  { %v157_v34 = vpop.permute.xlu0 %156 }
 0x49c   :  { %v164_v35 = vadd.f32 %v157_v34, %v152_v24 }
 0x49e   :  { %168 = vrot.lane.b32.xlu0 %v164_v35, %s259_s3 }
 0x49f   :  { %v159_v36 = vpop.permute.xlu1 %158  ;;  %v161_v37 = vpop.permute.xlu0 %160 }
 0x4a0   :  { %v165_v38 = vadd.f32 %v159_v36, %v153_v29  ;;  %v166_v39 = vadd.f32 %v161_v37, %v154_v30 }
 0x4a2   :  { %170 = vrot.lane.b32.xlu1 %v165_v38, %s259_s3  ;;  %172 = vrot.lane.b32.xlu0 %v166_v39, %s259_s3 }
 0x4a3   :  { %v163_v40 = vpop.permute.xlu1 %162 }
 0x4a4   :  { %v167_v41 = vadd.f32 %v163_v40, %v155_v33 }
 0x4a6   :  { %174 = vrot.lane.b32.xlu1 %v167_v41, %s259_s3 }
 0x510   :  { %v169_v42 = vpop.permute.xlu0 %168 }
 0x511   :  { %v176_v20 = vadd.f32 %v169_v42, %v164_v35 }
 0x513   :  { %180 = vrot.lane.b32.xlu0 %v176_v20, %s260_s28 }
 0x514   :  { %v171_v43 = vpop.permute.xlu1 %170  ;;  %v173_v44 = vpop.permute.xlu0 %172 }
 0x515   :  { %v177_v45 = vadd.f32 %v171_v43, %v165_v38  ;;  %v178_v46 = vadd.f32 %v173_v44, %v166_v39 }
 0x517   :  { %182 = vrot.lane.b32.xlu1 %v177_v45, %s260_s28  ;;  %184 = vrot.lane.b32.xlu0 %v178_v46, %s260_s28 }
 0x518   :  { %v175_v47 = vpop.permute.xlu1 %174 }
 0x519   :  { %v179_v48 = vadd.f32 %v175_v47, %v167_v41 }
 0x51b   :  { %186 = vrot.lane.b32.xlu1 %v179_v48, %s260_s28 }
 0x585   :  { %v181_v49 = vpop.permute.xlu0 %180 }
 0x586   :  { %v188_v50 = vadd.f32 %v181_v49, %v176_v20 }
 0x588   :  { %v192_v51 = vmul.f32 0.125, %v188_v50 }
 0x589   :  { %v183_v52 = vpop.permute.xlu1 %182  ;;  %v185_v53 = vpop.permute.xlu0 %184 }
 0x58a   :  { %v196_v55 = vadd.f32 1e-05, %v192_v51  ;;  %v189_v56 = vadd.f32 %v183_v52, %v177_v45  ;;  %v190_v57 = vadd.f32 %v185_v53, %v178_v46 }
 0x58c   :  { %247 = vrsqrt.f32 %v196_v55  ;;  %v193_v58 = vmul.f32 0.125, %v189_v56  ;;  %v194_v59 = vmul.f32 0.125, %v190_v57 }
 0x58d   :  { %v187_v60 = vpop.permute.xlu1 %186 }
 0x58e   :  { %v197_v63 = vadd.f32 1e-05, %v193_v58  ;;  %v198_v4 = vadd.f32 1e-05, %v194_v59  ;;  %v191_v0 = vadd.f32 %v187_v60, %v179_v48 }
 0x590   :  { %249 = vrsqrt.f32 %v197_v63  ;;  %v195_v5 = vmul.f32 0.125, %v191_v0 }
 0x591   :  { %251 = vrsqrt.f32 %v198_v4 }
 0x592   :  { %v199_v1 = vadd.f32 1e-05, %v195_v5 }
 0x594   :  { %253 = vrsqrt.f32 %v199_v1 }
 0x599   :  { %v248_v2 = vpop.eup %247 }
 0x59a   :  { %v204_v8 = vmul.f32 %v248_v2, %v348_v54 }
 0x59c   :  { %v215_v10 = vmul.f32 %v239_v7, %v204_v8 }
 0x59d   :  { %v250_v11 = vpop.eup %249 }
 0x59e   :  { %v252_v3 = vpop.eup %251  ;;  %v226_v12 = vadd.f32 %v240_v9, %v215_v10  ;;  %v205_v13 = vmul.f32 %v250_v11, %v353_v61 }
 0x59f   :  { %v206_v14 = vmul.f32 %v252_v3, %v356_v62 }
 0x5a0   :  { %230 = vst [vmem:[%s421_s4] sm:$0xff] %v226_v12  ;;  %v216_v15 = vmul.f32 %v239_v7, %v205_v13 }
 0x5a1   :  { %v254_v16 = vpop.eup %253  ;;  %v217_v17 = vmul.f32 %v239_v7, %v206_v14 }
 0x5a2   :  { %v227_v54 = vadd.f32 %v240_v9, %v216_v15  ;;  %v207_v18 = vmul.f32 %v254_v16, %v364_v6 }
 0x5a3   :  { %v228_v19 = vadd.f32 %v240_v9, %v217_v17 }
 0x5a4   :  { %231 = vst [vmem:[%s421_s4 + $0x8] sm:$0xff] %v227_v54  ;;  %v218_v21 = vmul.f32 %v239_v7, %v207_v18 }
 0x5a5   :  { %232 = vst [vmem:[%s421_s4 + $0x10] sm:$0xff] %v228_v19 }
 0x5a6   :  { %v229_v61 = vadd.f32 %v240_v9, %v218_v21 }
 0x5a8   :  { %233 = vst [vmem:[%s421_s4 + $0x18] sm:$0xff] %v229_v61 }

</bundles_post_ra>
